<compile_context>
chip_gen: v6e
topology: v6e:2x2x1
jax: 0.10.0
libtpu: 0.0.40
codegen_flags: <defaults>
</compile_context>

<pallas_src>
import jax
import jax.numpy as jnp
from jax.experimental import pallas as pl
from jax.experimental.pallas import tpu as pltpu


def _coalesce_runs(permutation):
    """Group the (static) channel index list into runs of consecutive sources.

    Returns a list of (src_start, dst_start, length) tuples such that
        out[:, dst_start:dst_start+length] = x[:, src_start:src_start+length]
    reproduces x[:, permutation].
    """
    perm = [int(p) for p in permutation]
    runs = []
    i = 0
    n = len(perm)
    while i < n:
        j = i + 1
        while j < n and perm[j] == perm[j - 1] + 1:
            j += 1
        runs.append((perm[i], i, j - i))
        i = j
    return runs


def _make_permute_kernel(runs, num_sems):
    """Kernel: pure HBM->HBM channel gather via back-to-back async DMAs."""

    def kernel(x_ref, o_ref, sem):
        def copy(run_idx):
            src, dst, ln = runs[run_idx]
            return pltpu.make_async_copy(
                x_ref.at[:, pl.ds(src, ln), :],
                o_ref.at[:, pl.ds(dst, ln), :],
                sem.at[run_idx % num_sems],
            )

        # Issue every run back-to-back (descriptor-only work on the misc slot),
        # then drain all of them before returning.
        for r in range(len(runs)):
            copy(r).start()
        for r in range(len(runs)):
            copy(r).wait()

    return kernel


def permute_channels(x: jax.Array, permutation) -> jax.Array:
    """Pallas TPU equivalent of `x[:, permutation]` for a 4-D NCHW tensor."""
    B, C, H, W = x.shape
    perm = [int(p) for p in permutation]
    P = len(perm)
    if P == 0:
        return jnp.zeros((B, 0, H, W), dtype=x.dtype)

    HW = H * W
    # Collapse spatial dims: each per-run DMA then moves B contiguous chunks
    # of (run_len * H * W) elements — large, contiguous, lane-dense transfers.
    x_flat = x.reshape(B, C, HW)

    runs = _coalesce_runs(perm)
    num_sems = max(1, min(8, len(runs)))  # ring of in-flight DMAs

    out_flat = pl.pallas_call(
        _make_permute_kernel(runs, num_sems),
        out_shape=jax.ShapeDtypeStruct((B, P, HW), x.dtype),
        in_specs=[pl.BlockSpec(memory_space=pl.ANY)],   # raw HBM ref, no auto-DMA
        out_specs=pl.BlockSpec(memory_space=pl.ANY),    # raw HBM ref, no auto-DMA
        scratch_shapes=[pltpu.SemaphoreType.DMA((num_sems,))],
    )(x_flat)

    return out_flat.reshape(B, P, H, W)


if __name__ == "__main__":
    key = jax.random.PRNGKey(0)
    B, C, H, W = 2, 4, 16, 16
    x = jax.random.normal(key, (B, C, H, W), dtype=jnp.float32)

    permutation = [2, 1, 0]  # same default as the PyTorch module

    out = jax.block_until_ready(permute_channels(x, permutation))

    # Reference check against plain JAX indexing (== torch `x[:, perm]`).
    ref = x[:, jnp.asarray(permutation)]
    assert out.shape == ref.shape, (out.shape, ref.shape)
    assert jnp.array_equal(out, ref), "Pallas permute mismatch vs reference"

    print("KERNEL_OK")
</pallas_src>

<mosaic_0001>
module attributes {stable_mosaic.version = 11 : i64} {
  func.func @kernel(%arg0: memref<2x4x256xf32, #tpu.memory_space<any>>, %arg1: memref<2x3x256xf32, #tpu.memory_space<any>>, %arg2: memref<3x!tpu.dma_semaphore, #tpu.memory_space<semaphore_mem>>) attributes {dimension_semantics = [], scalar_prefetch = 0 : i64, scratch_operands = 1 : i64, tpu.core_type = #tpu.core_type<tc>} {
    %c0_i32 = arith.constant 0 : i32
    %c0_i32_0 = arith.constant 0 : i32
    %c2_i32 = arith.constant 2 : i32
    %c0_i32_1 = arith.constant 0 : i32
    %0 = tpu.memref_slice %arg0[%c0_i32_0, %c2_i32, %c0_i32_1] : memref<2x4x256xf32, #tpu.memory_space<any>> -> memref<2x1x256xf32, #tpu.memory_space<any>>
    %c0_i32_2 = arith.constant 0 : i32
    %c0_i32_3 = arith.constant 0 : i32
    %c0_i32_4 = arith.constant 0 : i32
    %1 = tpu.memref_slice %arg1[%c0_i32_2, %c0_i32_3, %c0_i32_4] : memref<2x3x256xf32, #tpu.memory_space<any>> -> memref<2x1x256xf32, #tpu.memory_space<any>>
    %2 = tpu.memref_slice %arg2[%c0_i32] : memref<3x!tpu.dma_semaphore, #tpu.memory_space<semaphore_mem>> -> memref<1x!tpu.dma_semaphore, #tpu.memory_space<semaphore_mem>>
    %3 = tpu.memref_squeeze %2 : memref<1x!tpu.dma_semaphore, #tpu.memory_space<semaphore_mem>> -> memref<!tpu.dma_semaphore, #tpu.memory_space<semaphore_mem>>
    tpu.enqueue_dma source(%0 : memref<2x1x256xf32, #tpu.memory_space<any>>) target(%1 : memref<2x1x256xf32, #tpu.memory_space<any>>) target_semaphore(%3 : memref<!tpu.dma_semaphore, #tpu.memory_space<semaphore_mem>>)
    %c1_i32 = arith.constant 1 : i32
    %c0_i32_5 = arith.constant 0 : i32
    %c1_i32_6 = arith.constant 1 : i32
    %c0_i32_7 = arith.constant 0 : i32
    %4 = tpu.memref_slice %arg0[%c0_i32_5, %c1_i32_6, %c0_i32_7] : memref<2x4x256xf32, #tpu.memory_space<any>> -> memref<2x1x256xf32, #tpu.memory_space<any>>
    %c0_i32_8 = arith.constant 0 : i32
    %c1_i32_9 = arith.constant 1 : i32
    %c0_i32_10 = arith.constant 0 : i32
    %5 = tpu.memref_slice %arg1[%c0_i32_8, %c1_i32_9, %c0_i32_10] : memref<2x3x256xf32, #tpu.memory_space<any>> -> memref<2x1x256xf32, #tpu.memory_space<any>>
    %6 = tpu.memref_slice %arg2[%c1_i32] : memref<3x!tpu.dma_semaphore, #tpu.memory_space<semaphore_mem>> -> memref<1x!tpu.dma_semaphore, #tpu.memory_space<semaphore_mem>>
    %7 = tpu.memref_squeeze %6 : memref<1x!tpu.dma_semaphore, #tpu.memory_space<semaphore_mem>> -> memref<!tpu.dma_semaphore, #tpu.memory_space<semaphore_mem>>
    tpu.enqueue_dma source(%4 : memref<2x1x256xf32, #tpu.memory_space<any>>) target(%5 : memref<2x1x256xf32, #tpu.memory_space<any>>) target_semaphore(%7 : memref<!tpu.dma_semaphore, #tpu.memory_space<semaphore_mem>>)
    %c2_i32_11 = arith.constant 2 : i32
    %c0_i32_12 = arith.constant 0 : i32
    %c0_i32_13 = arith.constant 0 : i32
    %c0_i32_14 = arith.constant 0 : i32
    %8 = tpu.memref_slice %arg0[%c0_i32_12, %c0_i32_13, %c0_i32_14] : memref<2x4x256xf32, #tpu.memory_space<any>> -> memref<2x1x256xf32, #tpu.memory_space<any>>
    %c0_i32_15 = arith.constant 0 : i32
    %c2_i32_16 = arith.constant 2 : i32
    %c0_i32_17 = arith.constant 0 : i32
    %9 = tpu.memref_slice %arg1[%c0_i32_15, %c2_i32_16, %c0_i32_17] : memref<2x3x256xf32, #tpu.memory_space<any>> -> memref<2x1x256xf32, #tpu.memory_space<any>>
    %10 = tpu.memref_slice %arg2[%c2_i32_11] : memref<3x!tpu.dma_semaphore, #tpu.memory_space<semaphore_mem>> -> memref<1x!tpu.dma_semaphore, #tpu.memory_space<semaphore_mem>>
    %11 = tpu.memref_squeeze %10 : memref<1x!tpu.dma_semaphore, #tpu.memory_space<semaphore_mem>> -> memref<!tpu.dma_semaphore, #tpu.memory_space<semaphore_mem>>
    tpu.enqueue_dma source(%8 : memref<2x1x256xf32, #tpu.memory_space<any>>) target(%9 : memref<2x1x256xf32, #tpu.memory_space<any>>) target_semaphore(%11 : memref<!tpu.dma_semaphore, #tpu.memory_space<semaphore_mem>>)
    %c0_i32_18 = arith.constant 0 : i32
    %c0_i32_19 = arith.constant 0 : i32
    %c2_i32_20 = arith.constant 2 : i32
    %c0_i32_21 = arith.constant 0 : i32
    %12 = tpu.memref_slice %arg0[%c0_i32_19, %c2_i32_20, %c0_i32_21] : memref<2x4x256xf32, #tpu.memory_space<any>> -> memref<2x1x256xf32, #tpu.memory_space<any>>
    %c0_i32_22 = arith.constant 0 : i32
    %c0_i32_23 = arith.constant 0 : i32
    %c0_i32_24 = arith.constant 0 : i32
    %13 = tpu.memref_slice %arg1[%c0_i32_22, %c0_i32_23, %c0_i32_24] : memref<2x3x256xf32, #tpu.memory_space<any>> -> memref<2x1x256xf32, #tpu.memory_space<any>>
    %14 = tpu.memref_slice %arg2[%c0_i32_18] : memref<3x!tpu.dma_semaphore, #tpu.memory_space<semaphore_mem>> -> memref<1x!tpu.dma_semaphore, #tpu.memory_space<semaphore_mem>>
    %15 = tpu.memref_squeeze %14 : memref<1x!tpu.dma_semaphore, #tpu.memory_space<semaphore_mem>> -> memref<!tpu.dma_semaphore, #tpu.memory_space<semaphore_mem>>
    tpu.wait_dma2 semaphore(%15 : memref<!tpu.dma_semaphore, #tpu.memory_space<semaphore_mem>>) src(%12 : memref<2x1x256xf32, #tpu.memory_space<any>>) dst(%13 : memref<2x1x256xf32, #tpu.memory_space<any>>)
    %c1_i32_25 = arith.constant 1 : i32
    %c0_i32_26 = arith.constant 0 : i32
    %c1_i32_27 = arith.constant 1 : i32
    %c0_i32_28 = arith.constant 0 : i32
    %16 = tpu.memref_slice %arg0[%c0_i32_26, %c1_i32_27, %c0_i32_28] : memref<2x4x256xf32, #tpu.memory_space<any>> -> memref<2x1x256xf32, #tpu.memory_space<any>>
    %c0_i32_29 = arith.constant 0 : i32
    %c1_i32_30 = arith.constant 1 : i32
    %c0_i32_31 = arith.constant 0 : i32
    %17 = tpu.memref_slice %arg1[%c0_i32_29, %c1_i32_30, %c0_i32_31] : memref<2x3x256xf32, #tpu.memory_space<any>> -> memref<2x1x256xf32, #tpu.memory_space<any>>
    %18 = tpu.memref_slice %arg2[%c1_i32_25] : memref<3x!tpu.dma_semaphore, #tpu.memory_space<semaphore_mem>> -> memref<1x!tpu.dma_semaphore, #tpu.memory_space<semaphore_mem>>
    %19 = tpu.memref_squeeze %18 : memref<1x!tpu.dma_semaphore, #tpu.memory_space<semaphore_mem>> -> memref<!tpu.dma_semaphore, #tpu.memory_space<semaphore_mem>>
    tpu.wait_dma2 semaphore(%19 : memref<!tpu.dma_semaphore, #tpu.memory_space<semaphore_mem>>) src(%16 : memref<2x1x256xf32, #tpu.memory_space<any>>) dst(%17 : memref<2x1x256xf32, #tpu.memory_space<any>>)
    %c2_i32_32 = arith.constant 2 : i32
    %c0_i32_33 = arith.constant 0 : i32
    %c0_i32_34 = arith.constant 0 : i32
    %c0_i32_35 = arith.constant 0 : i32
    %20 = tpu.memref_slice %arg0[%c0_i32_33, %c0_i32_34, %c0_i32_35] : memref<2x4x256xf32, #tpu.memory_space<any>> -> memref<2x1x256xf32, #tpu.memory_space<any>>
    %c0_i32_36 = arith.constant 0 : i32
    %c2_i32_37 = arith.constant 2 : i32
    %c0_i32_38 = arith.constant 0 : i32
    %21 = tpu.memref_slice %arg1[%c0_i32_36, %c2_i32_37, %c0_i32_38] : memref<2x3x256xf32, #tpu.memory_space<any>> -> memref<2x1x256xf32, #tpu.memory_space<any>>
    %22 = tpu.memref_slice %arg2[%c2_i32_32] : memref<3x!tpu.dma_semaphore, #tpu.memory_space<semaphore_mem>> -> memref<1x!tpu.dma_semaphore, #tpu.memory_space<semaphore_mem>>
    %23 = tpu.memref_squeeze %22 : memref<1x!tpu.dma_semaphore, #tpu.memory_space<semaphore_mem>> -> memref<!tpu.dma_semaphore, #tpu.memory_space<semaphore_mem>>
    tpu.wait_dma2 semaphore(%23 : memref<!tpu.dma_semaphore, #tpu.memory_space<semaphore_mem>>) src(%20 : memref<2x1x256xf32, #tpu.memory_space<any>>) dst(%21 : memref<2x1x256xf32, #tpu.memory_space<any>>)
    return
  }
}

</mosaic_0001>

<bundles_post_ra>
// kernel: tpu_custom_call.1
= control target key start
LH: loop header
LB: loop body
LE: loop exit
PB: predicated region body
PF: predicated region fallthrough
CT: control target
= control target key end

     0   :  { %s172_s0 = inlined_call_operand.hbm [shape: f32[2,4,256], index: 0, kind: input, shape index: {}]   ;;  %s173_s1 = inlined_call_operand.vmem [shape: f32[2,3,256], index: 1, kind: output, shape index: {}]  }
   0x1   :  { %s6_s8 = scalar_lea.hbm %s172_s0, 32  ;;  %s8_s11 = sshll.u32 %s173_s1, 4  ;;  %s150_s11 = int_to_ptr.vmem [resolvable:$true] %s8_s11 }
   0x2   :  { %s12_s14 = scalar_lea.hbm %s172_s0, 16  ;;  %s70_s15 = scalar_lea.vmem %s150_s11, 64 }
   0x3   :  { %p71_p0 = scmp.ne.s32.totalorder %s150_s11, %s70_s15  ;;  %s74_s16 = scalar_lea.vmem %s150_s11, 256 }
   0x4   :  { %p75_p1 = scmp.lt.s32.totalorder %s150_s11, %s150_s11  ;;  %p76_p2 = scmp.lt.s32.totalorder %s74_s16, %s70_s15 }
   0x6   :  { %p77_p3 = por %p76_p2, %p75_p1 }
   0x8   :  { %p78_p4 = pnand %p77_p3, %p71_p0 }
   0xa   :  { %81 = shalt.err (!%p78_p4)  }
   0xb   :  { %s132_s17 = smov 64   ;;  %s133_s18 = smov 1  }
   0xc   :  { %11 = dma.hbm_to_vmem [thread:$0]  %s6_s8, 64, %s150_s11, [#allocation2], %s132_s17, %s132_s17, %s133_s18 }
   0xd   :  { %s13_s21 = scalar_lea.vmem %s173_s1, 1  ;;  %s20_s24 = scalar_lea.vmem %s173_s1, 2 }
   0xe   :  { %s16_s25 = sshll.u32 %s13_s21, 4  ;;  %s23_s26 = sshll.u32 %s20_s24, 4  ;;  %s17_s25 = int_to_ptr.vmem [resolvable:$true] %s16_s25  ;;  %s24_s26 = int_to_ptr.vmem [resolvable:$true] %s23_s26 }
   0xf   :  { %s93_s27 = scalar_lea.vmem %s17_s25, 64  ;;  %p98_p6 = scmp.lt.s32.totalorder %s17_s25, %s150_s11 }
  0x10   :  { %p94_p5 = scmp.ne.s32.totalorder %s17_s25, %s93_s27  ;;  %p99_p7 = scmp.lt.s32.totalorder %s74_s16, %s93_s27 }
  0x12   :  { %p100_p8 = por %p99_p7, %p98_p6 }
  0x14   :  { %p101_p9 = pnand %p100_p8, %p94_p5 }
  0x16   :  { %104 = shalt.err (!%p101_p9)  }
  0x17   :  { %19 = dma.hbm_to_vmem [thread:$0]  %s12_s14, 64, %s17_s25, [#allocation2 + $0x1], %s132_s17, %s132_s17, %s133_s18 }
  0x18   :  { %s114_s28 = scalar_lea.vmem %s24_s26, 64  ;;  %p119_p11 = scmp.lt.s32.totalorder %s24_s26, %s150_s11 }
  0x19   :  { %p115_p10 = scmp.ne.s32.totalorder %s24_s26, %s114_s28  ;;  %p120_p12 = scmp.lt.s32.totalorder %s74_s16, %s114_s28 }
  0x1b   :  { %p121_p13 = por %p120_p12, %p119_p11 }
  0x1d   :  { %p122_p0 = pnand %p121_p13, %p115_p10 }
  0x1f   :  { %125 = shalt.err (!%p122_p0)  }
  0x20   :  { %26 = dma.hbm_to_vmem [thread:$0]  %s172_s0, 64, %s24_s26, [#allocation2 + $0x2], %s132_s17, %s132_s17, %s133_s18 }
  0x21   :  { %126 = dma.done.wait [#allocation2], 64 }
  0x22   :  { %127 = vsyncadd [#allocation2], 4294967232 }
  0x23   :  { %128 = dma.done.wait [#allocation2 + $0x1], 64 }
  0x24   :  { %129 = vsyncadd [#allocation2 + $0x1], 4294967232 }
  0x25   :  { %130 = dma.done.wait [#allocation2 + $0x2], 64 }
  0x26   :  { %131 = vsyncadd [#allocation2 + $0x2], 4294967232 }
  0x27   :  { %35 = vsyncmov [#allocation2] }
  0x2a   :  { %s36_s30 = vpop.sfrf %35 }
  0x2b   :  { %p55_p1 = scmp.ne.s32.totalorder %s36_s30, 0 }
  0x2d   :  { %40 = shalt.err (%p55_p1)  }
  0x2e   :  { %42 = vsyncmov [#allocation2 + $0x1] }
  0x31   :  { %s43_s2 = vpop.sfrf %42 }
  0x32   :  { %p56_p2 = scmp.ne.s32.totalorder %s43_s2, 0 }
  0x34   :  { %47 = shalt.err (%p56_p2)  }
  0x35   :  { %49 = vsyncmov [#allocation2 + $0x2] }
  0x38   :  { %s50_s3 = vpop.sfrf %49 }
  0x39   :  { %p57_p3 = scmp.ne.s32.totalorder %s50_s3, 0 }
  0x3b   :  { %54 = shalt.err (%p57_p3)  }

</bundles_post_ra>
